<compile_context>
chip_gen: v7x
topology: tpu7x:2x2x1
jax: 0.10.0
libtpu: 0.0.40
codegen_flags: <defaults>
</compile_context>

<pallas_src>
import functools

import jax
import jax.numpy as jnp
from jax import lax
from jax.experimental import pallas as pl
from jax.experimental.pallas import tpu as pltpu

_EPS = 1e-12          # F.normalize default eps (clamp on the norm)
_EPS2 = _EPS * _EPS   # same clamp applied to the squared norm (1e-24, f32-representable)


def _change_attn_kernel(x1_ref, x2_ref, o_ref, *, compute_dtype):
    # x1_ref / x2_ref: (1, C, TILE) VMEM tiles; o_ref: (1, 1, TILE).
    x1 = x1_ref[...].astype(compute_dtype)
    x2 = x2_ref[...].astype(compute_dtype)

    # Per-pixel squared norms and dot product over the channel (sublane) axis.
    # Products run in `compute_dtype` (bf16 on chips with a bf16 VALU); the
    # reduction always accumulates in f32.
    s1 = jnp.sum(x1 * x1, axis=1, keepdims=True, dtype=jnp.float32)
    s2 = jnp.sum(x2 * x2, axis=1, keepdims=True, dtype=jnp.float32)
    dot = jnp.sum(x1 * x2, axis=1, keepdims=True, dtype=jnp.float32)

    # dot / (max(||x1||, eps) * max(||x2||, eps)) == dot * rsqrt(max(s1, eps^2))
    #                                                    * rsqrt(max(s2, eps^2))
    # (two rsqrts on the EUP instead of two sqrts + a VPU divide).
    inv = lax.rsqrt(jnp.maximum(s1, _EPS2)) * lax.rsqrt(jnp.maximum(s2, _EPS2))
    sim = dot * inv
    o_ref[...] = ((sim + 1.0) * 0.5).astype(o_ref.dtype)


def _round_up(x, m):
    return ((x + m - 1) // m) * m


def _chip_config():
    """Per-generation VMEM budgets and megacore heuristic."""
    kind = ""
    try:
        kind = jax.devices()[0].device_kind.lower()
    except Exception:
        pass
    is_v7 = ("v7" in kind) or ("tpu7" in kind) or kind.endswith("7x")
    is_v6 = "v6" in kind
    is_v5 = "v5" in kind
    if is_v7:
        # 64 MiB physical VMEM per TensorCore; 2 cores -> want several parallel steps.
        return dict(input_budget=36 << 20, vmem_limit=52 << 20,
                    min_parallel_steps=8, native_bf16=True)
    if is_v6:
        # 128 MiB physical VMEM, single TensorCore, bf16 VALU.
        return dict(input_budget=56 << 20, vmem_limit=96 << 20,
                    min_parallel_steps=1, native_bf16=True)
    if is_v5:
        # 128 MiB physical VMEM, single TensorCore, no bf16 VALU -> f32 compute path.
        return dict(input_budget=56 << 20, vmem_limit=96 << 20,
                    min_parallel_steps=1, native_bf16=False)
    # Unknown chip: conservative numbers that fit every generation.
    return dict(input_budget=24 << 20, vmem_limit=48 << 20,
                min_parallel_steps=1, native_bf16=False)


def _pick_tile(B, C, HW, in_dtype, compute_dtype, cfg, *, max_tile=65536):
    """Pick a lane-tile width: multiple of 128, >= 128, sized against VMEM.

    VMEM accounting per lane column per grid step:
      * 2 inputs x 2 pipeline buffers of (C_pad, tile) blocks in the input dtype,
        where C_pad rounds C up to the native sublane tiling (8 rows f32,
        16 rows bf16, 32 rows int8),
      * live in-kernel intermediates: 3 product-sized arrays when compute dtype
        equals the input dtype, 5 when an explicit f32 upcast copy is made,
      * 2 output pipeline buffers (1 row padded to 8 sublanes),
      * a few (1, tile) f32 reduction results.
    """
    in_bytes = jnp.dtype(in_dtype).itemsize
    cd_bytes = jnp.dtype(compute_dtype).itemsize

    sublane_in = max(8, 32 // in_bytes)
    sublane_cd = max(8, 32 // cd_bytes)
    c_pad_in = _round_up(C, sublane_in)
    c_pad_cd = _round_up(C, sublane_cd)

    n_live = 3 if jnp.dtype(compute_dtype) == jnp.dtype(in_dtype) else 5

    per_lane = (4 * c_pad_in * in_bytes          # double-buffered inputs
                + n_live * c_pad_cd * cd_bytes   # in-kernel intermediates
                + 2 * 8 * in_bytes               # double-buffered output rows
                + 6 * 4)                         # (1, tile) f32 reduction results

    tile = cfg["input_budget"] // per_lane
    tile = min(tile, max_tile)

    hw_rounded = _round_up(HW, 128)
    tile = min(tile, hw_rounded)
    tile = max(128, (tile // 128) * 128)

    # v7x megacore only: keep enough evenly sized parallel grid steps to feed
    # both TensorCores; no-op on single-core v5e/v6e (min_parallel_steps == 1).
    want = cfg["min_parallel_steps"]
    if want > 1:
        total_steps = B * pl.cdiv(HW, tile)
        if total_steps < want and tile > 1024:
            blocks_per_batch = -(-want // B)                 # ceil(want / B)
            alt = _round_up(-(-HW // blocks_per_batch), 128)  # ceil(HW / blocks) -> x128
            tile = max(1024, min(tile, alt))

    return int(tile)


def change_attention_block(feat_T1, feat_T2, *, max_tile=65536):
    """Pallas equivalent of ChangeAttentionBlock.forward.

    feat_T1, feat_T2: (B, C, H, W) arrays (NCHW, like PyTorch).
    Returns: (B, 1, H, W) attention map in [0, 1].
    """
    assert feat_T1.shape == feat_T2.shape
    assert feat_T1.dtype == feat_T2.dtype
    B, C, H, W = feat_T1.shape
    HW = H * W

    # Free reshapes (same memory layout) — no extra HBM traffic.
    x1 = feat_T1.reshape(B, C, HW)
    x2 = feat_T2.reshape(B, C, HW)

    cfg = _chip_config()
    in_dtype = feat_T1.dtype
    if jnp.dtype(in_dtype) == jnp.dtype(jnp.float32):
        compute_dtype = jnp.float32
    elif cfg["native_bf16"] and jnp.dtype(in_dtype) == jnp.dtype(jnp.bfloat16):
        compute_dtype = jnp.bfloat16          # bf16 VALU products, f32 accumulation
    else:
        compute_dtype = jnp.float32           # v5e / unknown: full f32 upcast path

    tile = _pick_tile(B, C, HW, in_dtype, compute_dtype, cfg, max_tile=max_tile)

    # No padding pass: Pallas handles the ragged last block (masked partial store);
    # garbage lanes in the padded read region never cross lanes (all reductions
    # are over the channel axis) and their stores are dropped.
    grid = (B, pl.cdiv(HW, tile))
    in_spec = pl.BlockSpec((1, C, tile), lambda b, j: (b, 0, j))
    out_spec = pl.BlockSpec((1, 1, tile), lambda b, j: (b, 0, j))

    in_bytes = jnp.dtype(in_dtype).itemsize
    cost = pl.CostEstimate(
        flops=6 * B * C * HW,
        transcendentals=2 * B * HW,
        bytes_accessed=2 * B * C * HW * in_bytes + B * HW * in_bytes,
    )

    kernel = functools.partial(_change_attn_kernel, compute_dtype=compute_dtype)

    attn = pl.pallas_call(
        kernel,
        out_shape=jax.ShapeDtypeStruct((B, 1, HW), in_dtype),
        grid_spec=pltpu.PrefetchScalarGridSpec(
            num_scalar_prefetch=0,
            grid=grid,
            in_specs=[in_spec, in_spec],
            out_specs=out_spec,
        ),
        compiler_params=pltpu.CompilerParams(
            dimension_semantics=("parallel", "parallel"),
            vmem_limit_bytes=cfg["vmem_limit"],
        ),
        cost_estimate=cost,
    )(x1, x2)

    return attn.reshape(B, 1, H, W)


def _reference(feat_T1, feat_T2):
    B, C, H, W = feat_T1.shape
    v1 = feat_T1.reshape(B, C, H * W).transpose(0, 2, 1).astype(jnp.float32)
    v2 = feat_T2.reshape(B, C, H * W).transpose(0, 2, 1).astype(jnp.float32)
    n1 = jnp.maximum(jnp.linalg.norm(v1, axis=-1, keepdims=True), _EPS)
    n2 = jnp.maximum(jnp.linalg.norm(v2, axis=-1, keepdims=True), _EPS)
    sim = jnp.sum((v1 / n1) * (v2 / n2), axis=-1)
    return ((sim + 1.0) / 2.0).reshape(B, 1, H, W).astype(feat_T1.dtype)


if __name__ == "__main__":
    key = jax.random.PRNGKey(0)
    k1, k2 = jax.random.split(key)
    B, C, H, W = 2, 4, 16, 16
    feat_T1 = jax.random.normal(k1, (B, C, H, W), dtype=jnp.float32)
    feat_T2 = jax.random.normal(k2, (B, C, H, W), dtype=jnp.float32)

    out = change_attention_block(feat_T1, feat_T2)
    out = jax.block_until_ready(out)

    ref = _reference(feat_T1, feat_T2)
    assert out.shape == (B, 1, H, W)
    assert jnp.allclose(out, ref, atol=1e-5, rtol=1e-5)
    print("KERNEL_OK")
</pallas_src>

<mosaic_0001>
module attributes {stable_mosaic.version = 11 : i64} {
  func.func @_change_attn_kernel(%arg0: i32, %arg1: i32, %arg2: memref<1x4x256xf32, #tpu.memory_space<vmem>>, %arg3: memref<1x4x256xf32, #tpu.memory_space<vmem>>, %arg4: memref<1x1x256xf32, #tpu.memory_space<vmem>>) attributes {dimension_semantics = [#tpu.dimension_semantics<parallel>, #tpu.dimension_semantics<parallel>], iteration_bounds = array<i64: 2, 1>, scalar_prefetch = 0 : i64, scratch_operands = 0 : i64, tpu.core_type = #tpu.core_type<tc>, window_params = [{transform_indices = @transform_0, window_bounds = array<i64: 1, 4, 256>}, {transform_indices = @transform_1, window_bounds = array<i64: 1, 4, 256>}, {transform_indices = @transform_2, window_bounds = array<i64: 1, 1, 256>}]} {
    %c0 = arith.constant 0 : index
    %c0_0 = arith.constant 0 : index
    %c0_1 = arith.constant 0 : index
    %0 = vector.load %arg2[%c0, %c0_0, %c0_1] : memref<1x4x256xf32, #tpu.memory_space<vmem>>, vector<1x4x256xf32>
    %c0_2 = arith.constant 0 : index
    %c0_3 = arith.constant 0 : index
    %c0_4 = arith.constant 0 : index
    %1 = vector.load %arg3[%c0_2, %c0_3, %c0_4] : memref<1x4x256xf32, #tpu.memory_space<vmem>>, vector<1x4x256xf32>
    %2 = arith.mulf %0, %0 : vector<1x4x256xf32>
    %cst = arith.constant dense<0.000000e+00> : vector<1x256xf32>
    %3 = vector.multi_reduction <add>, %2, %cst [1] : vector<1x4x256xf32> to vector<1x256xf32>
    %4 = vector.shape_cast %3 : vector<1x256xf32> to vector<1x1x256xf32>
    %5 = arith.mulf %1, %1 : vector<1x4x256xf32>
    %cst_5 = arith.constant dense<0.000000e+00> : vector<1x256xf32>
    %6 = vector.multi_reduction <add>, %5, %cst_5 [1] : vector<1x4x256xf32> to vector<1x256xf32>
    %7 = vector.shape_cast %6 : vector<1x256xf32> to vector<1x1x256xf32>
    %8 = arith.mulf %0, %1 : vector<1x4x256xf32>
    %cst_6 = arith.constant dense<0.000000e+00> : vector<1x256xf32>
    %9 = vector.multi_reduction <add>, %8, %cst_6 [1] : vector<1x4x256xf32> to vector<1x256xf32>
    %10 = vector.shape_cast %9 : vector<1x256xf32> to vector<1x1x256xf32>
    %cst_7 = arith.constant 1.000000e-24 : f32
    %11 = vector.broadcast %cst_7 : f32 to vector<1x1x256xf32>
    %12 = arith.maximumf %4, %11 : vector<1x1x256xf32>
    %13 = math.rsqrt %12 : vector<1x1x256xf32>
    %cst_8 = arith.constant 1.000000e-24 : f32
    %14 = vector.broadcast %cst_8 : f32 to vector<1x1x256xf32>
    %15 = arith.maximumf %7, %14 : vector<1x1x256xf32>
    %16 = math.rsqrt %15 : vector<1x1x256xf32>
    %17 = arith.mulf %13, %16 : vector<1x1x256xf32>
    %18 = arith.mulf %10, %17 : vector<1x1x256xf32>
    %cst_9 = arith.constant 1.000000e+00 : f32
    %19 = vector.broadcast %cst_9 : f32 to vector<1x1x256xf32>
    %20 = arith.addf %18, %19 : vector<1x1x256xf32>
    %cst_10 = arith.constant 5.000000e-01 : f32
    %21 = vector.broadcast %cst_10 : f32 to vector<1x1x256xf32>
    %22 = arith.mulf %20, %21 : vector<1x1x256xf32>
    %c0_11 = arith.constant 0 : index
    %c0_12 = arith.constant 0 : index
    %c0_13 = arith.constant 0 : index
    %23 = vector.load %arg4[%c0_11, %c0_12, %c0_13] : memref<1x1x256xf32, #tpu.memory_space<vmem>>, vector<1x1x256xf32>
    tpu.vector_store %arg4[%c0_11, %c0_12, %c0_13], %22 {strides = array<i32>} : memref<1x1x256xf32, #tpu.memory_space<vmem>>, vector<1x1x256xf32>,
    return
  }
  func.func @transform_0(%arg0: i32, %arg1: i32) -> (i32, i32, i32) {
    %c0_i32 = arith.constant 0 : i32
    %c0_i32_0 = arith.constant 0 : i32
    return %arg0, %c0_i32, %arg1 : i32, i32, i32
  }
  func.func @transform_1(%arg0: i32, %arg1: i32) -> (i32, i32, i32) {
    %c0_i32 = arith.constant 0 : i32
    %c0_i32_0 = arith.constant 0 : i32
    return %arg0, %c0_i32, %arg1 : i32, i32, i32
  }
  func.func @transform_2(%arg0: i32, %arg1: i32) -> (i32, i32, i32) {
    %c0_i32 = arith.constant 0 : i32
    %c0_i32_0 = arith.constant 0 : i32
    return %arg0, %c0_i32, %arg1 : i32, i32, i32
  }
}

</mosaic_0001>

<bundles_post_ra>
// kernel: tpu_custom_call.1
= control target key start
LH: loop header
LB: loop body
LE: loop exit
PB: predicated region body
PF: predicated region fallthrough
CT: control target
= control target key end

     0   :  { %7 = vsyncpa [#allocation3], 0  ;;  %s938_s0 = inlined_call_operand.hbm [shape: f32[2,4,256], index: 0, kind: input, shape index: {}]   ;;  %s939_s1 = inlined_call_operand.hbm [shape: f32[2,4,256], index: 1, kind: input, shape index: {}]   ;;  %s940_s2 = inlined_call_operand.hbm [shape: f32[2,1,256], index: 2, kind: output, shape index: {}]  }
   0x1   :  { %9 = vsyncpa [#allocation3 + $0x1], 0 }
   0x2   :  { %10 = vsyncpa [#allocation6], 0 }
   0x3   :  { %12 = vsyncpa [#allocation6 + $0x1], 0 }
   0x4   :  { %13 = vsyncpa [#allocation4], 0 }
   0x5   :  { %15 = vsyncpa [#allocation4 + $0x1], 0  ;;  %s711_s9 = smov 0   ;;  %s713_s10 = smov 0  }
   0x6   :  { %s715_s11 = smov 0   ;;  %s717_s12 = smov 0  }
   0x7   :  { %s719_s13 = smov 0   ;;  %s721_s14 = smov 0  }
   0x8 LB: > { %s446_s15 = sadd.s32 4294967295, %s690_s14   ;;  %s447_s16 = sadd.s32 4294967294, %s690_s14   ;;  %s690_s14 = sphi %s721_s14, %s21_s14   ;;  %s686_s13 = sphi %s719_s13, %s960_s13   ;;  %s682_s12 = sphi %s717_s12, %s959_s12   ;;  %s678_s11 = sphi %s715_s11, %s958_s11   ;;  %s674_s10 = sphi %s713_s10, %s957_s10   ;;  %s670_s9 = sphi %s711_s9, %s956_s9  }
   0x9   : > { %s33_s17 = sadd.s32 1, %s686_s13  ;;  %s42_s18 = sadd.s32 1, %s678_s11 }
   0xa   : > { %p35_p0 = scmp.ge.s32.totalorder %s33_s17, 2  ;;  %p49_p1 = scmp.ne.s32.totalorder %s678_s11, %s674_s10 }
   0xb   : > { %p50_p2 = scmp.eq.s32.totalorder %s690_s14, 0  ;;  %p55_p3 = scmp.ne.s32.totalorder %s674_s10, %s670_s9 }
   0xc   : > { %s962_s17 = smov (%p35_p0, %s33_s17), 0  ;;  %p56_p5 = scmp.eq.s32.totalorder %s446_s15, 0 }
   0xd   : > { %p752_p4 = por %p50_p2, %p49_p1  ;;  %s37_s20 = ssub.s32 %s686_s13, %s962_s17 }
   0xe   : > { %p109_p6 = scmp.eq.s32.totalorder %s446_s15, 1  ;;  %p40_p7 = scmp.eq.s32.totalorder %s37_s20, 0 }
   0xf   : > { %p758_p8 = por %p56_p5, %p55_p3  ;;  %p115_p10 = scmp.eq.s32.totalorder %s447_s16, 1 }
  0x10   : > { %p762_p9 = por %p109_p6, %p49_p1  ;;  %p485_p13 = scmp.lt.s32.totalorder %s690_s14, 2 }
  0x11   : > { %s944_s21 = scalar_select %p758_p8, 1, 0 }
  0x12   : > { %s945_s22 = scalar_select %p762_p9, 1, 0 }
  0x13   : > { %s767_s23 = scalar_select %p40_p7, %s678_s11, %s42_s18  }
  0x14   : > { %p769_p11 = por %p115_p10, %p55_p3  ;;  %s776_s25 = sand.u32 1, %s678_s11  }
  0x15   : > { %s450_s26 = sshll.u32 %s776_s25, 3  ;;  %s465_s27 = sshll.u32 %s686_s13, 7 }
  0x16   : > { %s946_s24 = scalar_select %p769_p11, 1, 0 }
  0x17   : > { %s785_s30 = scalar_lea.hbm %s938_s0, %s465_s27  ;;  %s139_s3 = scalar_lea.vmem [#allocation2], %s450_s26 }
  0x18   : > { %s149_s4 = sshll.u32 %s139_s3, 4  ;;  %p793_p0 = pnand %p485_p13, %p752_p4  ;;  %s789_s4 = int_to_ptr.vmem [resolvable:$true] %s149_s4 }
  0x19   : > { %s136_s6 = scalar_lea.sflag [#allocation3], %s776_s25  ;;  %s544_s7 = scalar_lea.hbm %s785_s30, 128 }
  0x1a   : > { %p545_p3 = scmp.ne.s32.totalorder %s785_s30, %s544_s7  ;;  %p546_p5 = pneg %p793_p0 }
  0x1b   : > { %s549_s16 = scalar_lea.hbm %s938_s0, 256  ;;  %p550_p4 = scmp.lt.u32.totalorder %s785_s30, %s938_s0 }
  0x1c   : > { %p547_p6 = pnand %p546_p5, %p545_p3  ;;  %p551_p10 = scmp.lt.u32.totalorder %s549_s16, %s544_s7 }
  0x1d   : > { %p553_p12 = scmp.lt.u32.totalorder %s544_s7, %s785_s30 }
  0x1e   : > { %p548_p7 = pneg %p547_p6  ;;  %p552_p13 = por %p551_p10, %p550_p4 }
  0x20   : > { %p554_p1 = por %p553_p12, %p552_p13 }
  0x22   : > { %p555_p2 = pnand %p554_p1, %p548_p7 }
  0x24   : > { %558 = shalt.err (!%p555_p2)
}
  0x25   : > { %s559_s20 = scalar_lea.vmem %s789_s4, 128  ;;  %s692_s28 = smov [#allocation2]  }
  0x26   : > { %p560_p3 = scmp.ne.s32.totalorder %s789_s4, %s559_s20  ;;  %s564_s29 = sshll.u32 %s692_s28, 4  ;;  %s565_s29 = int_to_ptr.vmem [resolvable:$false] %s564_s29 }
  0x27   : > { %s566_s3 = scalar_lea.vmem %s565_s29, 256  ;;  %p567_p9 = scmp.lt.s32.totalorder %s789_s4, %s565_s29 }
  0x28   : > { %p562_p6 = pnand %p560_p3, %p546_p5  ;;  %p568_p4 = scmp.lt.s32.totalorder %s566_s3, %s559_s20 }
  0x2a   : > { %p563_p11 = pneg %p562_p6  ;;  %p569_p10 = por %p568_p4, %p567_p9 }
  0x2c   : > { %p570_p12 = pnand %p569_p10, %p563_p11 }
  0x2e   : > { %573 = shalt.err (!%p570_p12)
}
  0x2f   : > { %477 = dma.hbm_to_vmem [thread:$0]  (!%p793_p0), %s785_s30, 128, %s789_s4, %s136_s6  }
  0x30   : > { %p948_p1 = scmp.lt.s32.totalorder %s690_s14, 3  ;;  %p949_p2 = scmp.ge.s32.totalorder %s690_s14, 1 }
  0x31   : > { %s838_s16 = scalar_lea.hbm %s939_s1, %s465_s27  ;;  %s160_s18 = scalar_lea.vmem [#allocation5], %s450_s26 }
  0x32   : > { %p829_p7 = pnand %p949_p2, %p948_p1  ;;  %s170_s19 = sshll.u32 %s160_s18, 4  ;;  %s171_s19 = int_to_ptr.vmem [resolvable:$true] %s170_s19 }
  0x33   : > { %s157_s30 = scalar_lea.sflag [#allocation6], %s776_s25  ;;  %s574_s4 = scalar_lea.hbm %s838_s16, 128 }
  0x34   : > { %s950_s7 = scalar_select %p829_p7, 1, 0 }
  0x35   : > { %p575_p9 = scmp.ne.s32.totalorder %s838_s16, %s574_s4  ;;  %s579_s27 = scalar_lea.hbm %s939_s1, 256 }
  0x36   : > { %p580_p3 = scmp.lt.u32.totalorder %s838_s16, %s939_s1  ;;  %p581_p6 = scmp.lt.u32.totalorder %s579_s27, %s574_s4 }
  0x37   : > { %p577_p11 = pnand %p575_p9, %p546_p5  ;;  %p583_p10 = scmp.lt.u32.totalorder %s574_s4, %s838_s16 }
  0x38   : > { %p582_p4 = por %p581_p6, %p580_p3 }
  0x39   : > { %p578_p13 = pneg %p577_p11 }
  0x3a   : > { %p584_p12 = por %p583_p10, %p582_p4 }
  0x3c   : > { %p585_p1 = pnand %p584_p12, %p578_p13 }
  0x3e   : > { %588 = shalt.err (!%p585_p1)
}
  0x3f   : > { %s589_s25 = scalar_lea.vmem %s171_s19, 128  ;;  %s693_s26 = smov [#allocation5]  }
  0x40   : > { %p590_p2 = scmp.ne.s32.totalorder %s171_s19, %s589_s25  ;;  %s594_s3 = sshll.u32 %s693_s26, 4  ;;  %s595_s3 = int_to_ptr.vmem [resolvable:$false] %s594_s3 }
  0x41   : > { %s596_s8 = scalar_lea.vmem %s595_s3, 256  ;;  %p597_p8 = scmp.lt.s32.totalorder %s171_s19, %s595_s3 }
  0x42   : > { %p592_p9 = pnand %p590_p2, %p546_p5  ;;  %p598_p7 = scmp.lt.s32.totalorder %s596_s8, %s589_s25 }
  0x44   : > { %p593_p11 = pneg %p592_p9  ;;  %p599_p3 = por %p598_p7, %p597_p8 }
  0x46   : > { %p600_p6 = pnand %p599_p3, %p593_p11 }
  0x48   : > { %603 = shalt.err (!%p600_p6)
}
  0x49   : > { %480 = dma.hbm_to_vmem [thread:$0]  (!%p793_p0), %s838_s16, 128, %s171_s19, %s157_s30  }
  0x4a   : > { %p951_p13 = scmp.ne.s32.totalorder %s950_s7, 0 }
  0x4b   : > { %s865_s15 = sand.u32 (!%p951_p13), 1, %s674_s10   ;;  %p952_p5 = scmp.ne.s32.totalorder (!%p951_p13), %s944_s21, 0 }
  0x4c   : > { %179 = sbr.rel (%p951_p13) target bundleno = 146 (0x92), region = 28  ;;  %s457_s18 = sshll.u32 (!%p951_p13), %s865_s15, 3 }
  0x4d   : > { %s182_s4 = scalar_lea.sflag (!%p951_p13), [#allocation3], %s865_s15  ;;  %s185_s6 = scalar_lea.vmem (!%p951_p13), [#allocation2], %s457_s18 }
  0x53   : > { %657 = dma.done.wait (%p952_p5), %s182_s4, 128  }
  0x54   : > { %659 = vsyncadd (%p952_p5), %s182_s4, 4294967168  ;;  %s191_s5 = scalar_lea.sflag [#allocation6], %s865_s15  ;;  %s194_s16 = scalar_lea.vmem [#allocation5], %s457_s18 }
  0x55   : > { %661 = dma.done.wait (%p952_p5), %s191_s5, 128  }
  0x56   : > { %663 = vsyncadd (%p952_p5), %s191_s5, 4294967168  ;;  %v223_v0 = vld [vmem:[%s185_s6] sm:$0xff]  ;;  %v224_v1 = vld [vmem:[%s194_s16] sm:$0xff]  ;;  %vm229_vm0 = vcmask 1043456   ;;  %v694_v58 = vmov 1966171168   ;;  %v302_v60 = vlaneseq }
  0x57   : > { %v225_v2 = vmul.f32 %v223_v0, %v223_v0  ;;  %v244_v3 = vmul.f32 %v224_v1, %v224_v1  ;;  %v262_v4 = vmul.f32 %v224_v1, %v223_v0  ;;  %v300_v59 = vunpack.c.l.s4 %v694_v58  ;;  %s459_s21 = sshll.u32 %s865_s15, 1  ;;  %s467_s30 = sshll.u32 %s682_s12, 5 }
  0x58   : > { %s219_s7 = scalar_lea.vmem [#allocation7], %s459_s21  ;;  %vm316_vm1 = vcmp.lt.s32.totalorder %v302_v60, 256  ;;  %s891_s28 = scalar_lea.hbm %s940_s2, %s467_s30 }
  0x59   : > { %v227_v5 = vcombine.high %v225_v2, %v225_v2  ;;  %v230_v6 = vsel %vm229_vm0, %v225_v2, 0.0  ;;  %v246_v7 = vcombine.high %v244_v3, %v244_v3  ;;  %v248_v8 = vsel %vm229_vm0, %v244_v3, 0.0  ;;  %s336_s19 = sshll.u32 %s219_s7, 4  ;;  %s320_s29 = scalar_lea.sflag [#allocation4], %s865_s15  ;;  %s886_s19 = int_to_ptr.vmem [resolvable:$true] %s336_s19 }
  0x5a   : > { %v231_v9 = vrot.slane %v230_v6, 4  ;;  %v249_v10 = vrot.slane %v248_v8, 4  ;;  %v264_v11 = vcombine.high %v262_v4, %v262_v4  ;;  %v266_v12 = vsel %vm229_vm0, %v262_v4, 0.0  ;;  %s604_s25 = scalar_lea.vmem %s886_s19, 32  ;;  %p953_p0 = scmp.ne.s32.totalorder %s945_s22, 0 }
  0x5b   : > { %v237_v13 = vsel %vm229_vm0, %v227_v5, 0.0  ;;  %v255_v14 = vsel %vm229_vm0, %v246_v7, 0.0  ;;  %v267_v19 = vrot.slane %v266_v12, 4  ;;  %v301_v2 = vunpack.c.0.s8 %v300_v59  ;;  %p605_p8 = scmp.ne.s32.totalorder %s886_s19, %s604_s25  ;;  %s695_s12 = smov [#allocation7]  }
  0x5c   : > { %v232_v15 = vadd.f32 %v231_v9, %v230_v6  ;;  %v238_v16 = vrot.slane %v237_v13, 4  ;;  %v250_v17 = vadd.f32 %v249_v10, %v248_v8  ;;  %v256_v18 = vrot.slane %v255_v14, 4  ;;  %s608_s26 = sshll.u32 %s695_s12, 4  ;;  %s609_s26 = int_to_ptr.vmem [resolvable:$false] %s608_s26 }
  0x5d   : > { %v273_v20 = vsel %vm229_vm0, %v264_v11, 0.0  ;;  %v268_v30 = vadd.f32 %v267_v19, %v266_v12  ;;  %v303_v3 = vshrl.u32 %v302_v60, 7  ;;  %p606_p7 = pnand %p605_p8, %p953_p0  ;;  %s610_s3 = scalar_lea.vmem %s609_s26, 64 }
  0x5e   : > { %v233_v21 = vrot.slane %v232_v15, 2  ;;  %v239_v22 = vadd.f32 %v238_v16, %v237_v13  ;;  %v251_v23 = vrot.slane %v250_v17, 2  ;;  %v257_v24 = vadd.f32 %v256_v18, %v255_v14  ;;  %p611_p10 = scmp.lt.s32.totalorder %s886_s19, %s609_s26  ;;  %p612_p12 = scmp.lt.s32.totalorder %s610_s3, %s604_s25 }
  0x5f   : > { %v274_v25 = vrot.slane %v273_v20, 4  ;;  %v269_v40 = vrot.slane %v268_v30, 2  ;;  %v304_v7 = vsub.s32 %v301_v2, %v303_v3  ;;  %p607_p4 = pneg %p606_p7 }
  0x60   : > { %v234_v26 = vadd.f32 %v233_v21, %v232_v15  ;;  %v240_v27 = vrot.slane %v239_v22, 2  ;;  %v252_v28 = vadd.f32 %v251_v23, %v250_v17  ;;  %v258_v29 = vrot.slane %v257_v24, 2  ;;  %p613_p1 = por %p612_p12, %p611_p10 }
  0x61   : > { %v275_v35 = vadd.f32 %v274_v25, %v273_v20  ;;  %v270_v48 = vadd.f32 %v269_v40, %v268_v30 }
  0x62   : > { %v235_v31 = vrot.slane %v234_v26, 1  ;;  %v241_v32 = vadd.f32 %v240_v27, %v239_v22  ;;  %v253_v33 = vrot.slane %v252_v28, 1  ;;  %v259_v34 = vadd.f32 %v258_v29, %v257_v24  ;;  %p614_p2 = pnand %p613_p1, %p607_p4 }
  0x63   : > { %v276_v45 = vrot.slane %v275_v35, 2  ;;  %v271_v50 = vrot.slane %v270_v48, 1 }
  0x64   : > { %v236_v36 = vadd.f32 %v235_v31, %v234_v26  ;;  %v242_v37 = vrot.slane %v241_v32, 1  ;;  %v254_v38 = vadd.f32 %v253_v33, %v252_v28  ;;  %v260_v39 = vrot.slane %v259_v34, 1 }
  0x65   : > { %v277_v49 = vadd.f32 %v276_v45, %v275_v35  ;;  %v272_v53 = vadd.f32 %v271_v50, %v270_v48 }
  0x66   : > { %v243_v41 = vadd.f32 %v242_v37, %v241_v32  ;;  %v261_v42 = vadd.f32 %v260_v39, %v259_v34  ;;  %v280_v43 = vmax.f32 %v236_v36, 1e-24  ;;  %v284_v44 = vmax.f32 %v254_v38, 1e-24 }
  0x67   : > { %v278_v51 = vrot.slane %v277_v49, 1 }
  0x68   : > { %v281_v46 = vmax.f32 %v243_v41, 1e-24  ;;  %536 = vrsqrt.f32 %v280_v43  ;;  %v285_v47 = vmax.f32 %v261_v42, 1e-24 }
  0x69   : > { %538 = vrsqrt.f32 %v284_v44  ;;  %v279_v56 = vadd.f32 %v278_v51, %v277_v49 }
  0x6a   : > { %540 = vrsqrt.f32 %v281_v46 }
  0x6b   : > { %542 = vrsqrt.f32 %v285_v47 }
  0x72   : > { %v537_v52 = vpop.eup %536 }
  0x73   : > { %v539_v54 = vpop.eup %538 }
  0x74   : > { %v541_v55 = vpop.eup %540  ;;  %v288_v57 = vmul.f32 %v539_v54, %v537_v52 }
  0x75   : > { %v543_v61 = vpop.eup %542 }
  0x76   : > { %v289_v62 = vmul.f32 %v543_v61, %v541_v55  ;;  %v290_v63 = vmul.f32 %v288_v57, %v272_v53 }
  0x78   : > { %v291_v0 = vmul.f32 %v289_v62, %v279_v56  ;;  %v292_v1 = vadd.f32 1.0, %v290_v63 }
  0x7a   : > { %v293_v4 = vadd.f32 1.0, %v291_v0  ;;  %v294_v5 = vmul.f32 0.5, %v292_v1 }
  0x7c   : > { %v295_v6 = vmul.f32 0.5, %v293_v4 }
  0x7e   : > { %v298_v8 = vcombine.low %v294_v5, %v295_v6 }
  0x80   : > { %v305_v9 = vrot.slane %v298_v8, %v304_v7 }
  0x82   : > { %v312_v10 = vrot.slane %v305_v9, %v304_v7 }
  0x84   : > { %318 = vst.msk [vmem:[%s219_s7] sm:$0x3] %vm316_vm1, %v312_v10 }
  0x85   : > { %617 = shalt.err (!%p614_p2)
}
  0x86   : > { %s618_s8 = scalar_lea.hbm %s891_s28, 32  ;;  %s622_s4 = scalar_lea.hbm %s940_s2, 64 }
  0x87   : > { %p619_p9 = scmp.ne.s32.totalorder %s891_s28, %s618_s8  ;;  %p623_p6 = scmp.lt.u32.totalorder %s891_s28, %s940_s2 }
  0x88   : > { %p624_p13 = scmp.lt.u32.totalorder %s622_s4, %s618_s8  ;;  %p626_p8 = scmp.lt.u32.totalorder %s618_s8, %s891_s28 }
  0x89   : > { %p620_p11 = pnand %p619_p9, %p953_p0 }
  0x8a   : > { %p625_p5 = por %p624_p13, %p623_p6 }
  0x8b   : > { %p621_p3 = pneg %p620_p11 }
  0x8c   : > { %p627_p7 = por %p626_p8, %p625_p5 }
  0x8e   : > { %p628_p4 = pnand %p627_p7, %p621_p3 }
  0x90   : > { %631 = shalt.err (!%p628_p4)
}
  0x91   : > { %472 = dma.vmem_to_hbm [thread:$0]  (%p953_p0), %s886_s19, 32, %s891_s28, %s320_s29  }
  0x92 PF: > { %s348_s16 = sand.u32 1, %s670_s9   ;;  %p954_p10 = scmp.ne.s32.totalorder %s946_s24, 0 }
  0x93   : > { %p955_p12 = scmp.ge.s32.totalorder %s690_s14, 2  ;;  %s349_s21 = scalar_lea.sflag [#allocation4], %s348_s16 }
  0x95   : > { %p482_p1 = pnand %p955_p12, %p954_p10 }
  0x97   : > { %665 = dma.done.wait (!%p482_p1), %s349_s21, 32  }
  0x98   : > { %667 = vsyncadd (!%p482_p1), %s349_s21, 4294967264  ;;  %s21_s14 = sadd.s32 1, %s690_s14   ;;  %s956_s9 = smov %s674_s10 }
  0x99   : > { %p18_p2 = scmp.ge.s32.totalorder %s21_s14, 4   ;;  %s957_s10 = smov %s678_s11 }
  0x9a   : > { %s958_s11 = smov %s767_s23  ;;  %s959_s12 = smov %s686_s13 }
  0x9b   : > { %s960_s13 = smov %s962_s17  ;;  %20 = sbr.rel (!%p18_p2) target bundleno = 8 (0x8), region = 86 }
  0xa2   :  { %354 = vsyncpa [#allocation3], 1 }
  0xa3   :  { %356 = vsyncpa [#allocation3 + $0x1], 1 }
  0xa4   :  { %357 = vsyncpa [#allocation6], 1 }
  0xa5   :  { %359 = vsyncpa [#allocation6 + $0x1], 1 }
  0xa6   :  { %360 = vsyncpa [#allocation4], 1 }
  0xa7   :  { %362 = vsyncpa [#allocation4 + $0x1], 1 }

</bundles_post_ra>
